<compile_context>
chip_gen: v7x
topology: tpu7x:2x2x1
jax: 0.10.0
libtpu: 0.0.40
codegen_flags: <defaults>
</compile_context>

<pallas_src>
import jax
import jax.numpy as jnp
from jax.experimental import pallas as pl
from jax.experimental.pallas import tpu as pltpu


_LANES = 512                       # lane-dense slab width (multiple of 128)
_TARGET_BLOCK_BYTES = 4 << 20      # ~4 MiB per block


def _identity_kernel(x_ref, o_ref):
    # The entire forward semantics of Identity: a tile copy.
    o_ref[...] = x_ref[...]


def _sublane_pack(dtype) -> int:
    """Packed sublane count per vreg for this dtype (8 f32, 16 bf16, 32 int8/fp8)."""
    itemsize = jnp.dtype(dtype).itemsize
    if itemsize >= 4:
        return 8
    if itemsize == 2:
        return 16
    return 32


def identity_forward(x, use_pallas: bool = True):
    """Identity forward pass.

    use_pallas=False is the production path (no kernel, no HBM traffic).
    use_pallas=True routes through a Pallas copy kernel with lane-dense,
    multi-MiB, rows-only tiling and in/out buffer aliasing.
    """
    if not use_pallas:
        return x  # Identity requires zero compute — best "kernel" is no kernel.

    orig_shape = x.shape
    total = x.size
    if total == 0:
        return x

    itemsize = jnp.dtype(x.dtype).itemsize
    pack = _sublane_pack(x.dtype)

    # ---- Lane-dense slab layout -------------------------------------------
    flat = x.reshape(-1)
    rows = -(-total // _LANES)                       # ceil(total / 512)

    # Rows-only tiling, full 512-lane width per block, ~4 MiB target.
    block_rows = max(pack, (_TARGET_BLOCK_BYTES // (_LANES * itemsize)))
    block_rows = (block_rows // pack) * pack         # multiple of sublane pack
    if rows <= block_rows:
        block_rows = -(-rows // pack) * pack         # small input: one block

    padded_rows = -(-rows // block_rows) * block_rows
    padded_total = padded_rows * _LANES
    if padded_total != total:
        flat = jnp.pad(flat, (0, padded_total - total))
    slab = flat.reshape(padded_rows, _LANES)

    grid = (padded_rows // block_rows,)

    # VMEM budget: in + out, double-buffered (4x block) plus headroom.
    # Capped well below v7x's 64 MiB physical VMEM.
    block_bytes = block_rows * _LANES * itemsize
    vmem_limit = int(min(48 << 20, max(8 << 20, 6 * block_bytes)))

    out = pl.pallas_call(
        _identity_kernel,
        out_shape=jax.ShapeDtypeStruct(slab.shape, slab.dtype),
        grid=grid,
        in_specs=[pl.BlockSpec((block_rows, _LANES), lambda i: (i, 0))],
        out_specs=pl.BlockSpec((block_rows, _LANES), lambda i: (i, 0)),
        # Share the HBM buffer between input and output (no extra allocation).
        input_output_aliases={0: 0},
        compiler_params=pltpu.CompilerParams(
            dimension_semantics=("parallel",),   # v7x: both TCs stream rows
            vmem_limit_bytes=vmem_limit,
        ),
        cost_estimate=pl.CostEstimate(
            flops=0,
            transcendentals=0,
            bytes_accessed=2 * padded_total * itemsize,
        ),
    )(slab)

    if padded_total != total:
        out = out.reshape(-1)[:total]
    return out.reshape(orig_shape)


if __name__ == "__main__":
    key = jax.random.PRNGKey(0)
    # NCHW input, consistent with pix2pixhd usage.
    x = jax.random.normal(key, (2, 4, 16, 16), dtype=jnp.float32)

    # Kernel path (exercises the Pallas copy).
    y = identity_forward(x, use_pallas=True)
    jax.block_until_ready(y)
    assert y.shape == x.shape
    assert y.dtype == x.dtype
    assert bool(jnp.all(y == x))

    # Production path (no kernel at all) — also identical, by construction.
    y_fast = identity_forward(x, use_pallas=False)
    assert y_fast is x

    print("KERNEL_OK")
</pallas_src>

<mosaic_0001>
module attributes {stable_mosaic.version = 11 : i64} {
  func.func @_identity_kernel(%arg0: i32, %arg1: memref<8x512xf32, #tpu.memory_space<vmem>>, %arg2: memref<8x512xf32, #tpu.memory_space<vmem>>) attributes {dimension_semantics = [#tpu.dimension_semantics<parallel>], iteration_bounds = array<i64: 1>, scalar_prefetch = 0 : i64, scratch_operands = 0 : i64, tpu.core_type = #tpu.core_type<tc>, window_params = [{transform_indices = @transform_0, window_bounds = array<i64: 8, 512>}, {transform_indices = @transform_1, window_bounds = array<i64: 8, 512>}]} {
    %c0 = arith.constant 0 : index
    %c0_0 = arith.constant 0 : index
    %0 = vector.load %arg1[%c0, %c0_0] : memref<8x512xf32, #tpu.memory_space<vmem>>, vector<8x512xf32>
    %c0_1 = arith.constant 0 : index
    %c0_2 = arith.constant 0 : index
    %1 = vector.load %arg2[%c0_1, %c0_2] : memref<8x512xf32, #tpu.memory_space<vmem>>, vector<8x512xf32>
    tpu.vector_store %arg2[%c0_1, %c0_2], %0 {strides = array<i32>} : memref<8x512xf32, #tpu.memory_space<vmem>>, vector<8x512xf32>,
    return
  }
  func.func @transform_0(%arg0: i32) -> (i32, i32) {
    %c0_i32 = arith.constant 0 : i32
    %c0_i32_0 = arith.constant 0 : i32
    return %arg0, %c0_i32 : i32, i32
  }
  func.func @transform_1(%arg0: i32) -> (i32, i32) {
    %c0_i32 = arith.constant 0 : i32
    %c0_i32_0 = arith.constant 0 : i32
    return %arg0, %c0_i32 : i32, i32
  }
}

</mosaic_0001>

<bundles_post_ra>
// kernel: tpu_custom_call.1
= control target key start
LH: loop header
LB: loop body
LE: loop exit
PB: predicated region body
PF: predicated region fallthrough
CT: control target
= control target key end

     0   :  { %6 = vsyncpa [#allocation3], 0  ;;  %s130_s0 = inlined_call_operand.hbm [shape: f32[8,512], index: 0, kind: input, shape index: {}, may-alias: {0,1}]   ;;  %s131_s1 = inlined_call_operand.hbm [shape: f32[8,512], index: 1, kind: output, shape index: {}, may-alias: {0,1}]  }
   0x1   :  { %7 = vsyncpa [#allocation4], 0  ;;  %s94_s6 = smov [#allocation2]   ;;  %s46_s10 = scalar_lea.hbm %s130_s0, 512 }
   0x2   :  { %s14_s7 = sshll.u32 %s94_s6, 4  ;;  %p47_p0 = scmp.ne.s32.totalorder %s130_s0, %s46_s10  ;;  %s15_s7 = int_to_ptr.vmem [resolvable:$true] %s14_s7 }
   0x3   :  { %p50_p1 = scmp.lt.u32.totalorder %s46_s10, %s130_s0 }
   0x5   :  { %p52_p2 = pnand %p50_p1, %p47_p0 }
   0x7   :  { %55 = shalt.err (!%p52_p2)
}
   0x8   :  { %s56_s15 = scalar_lea.vmem %s15_s7, 512  ;;  %p61_p4 = scmp.lt.s32.totalorder %s15_s7, %s15_s7 }
   0x9   :  { %p57_p3 = scmp.ne.s32.totalorder %s15_s7, %s56_s15  ;;  %p62_p5 = scmp.lt.s32.totalorder %s56_s15, %s56_s15 }
   0xb   :  { %p63_p6 = por %p62_p5, %p61_p4 }
   0xd   :  { %p64_p7 = pnand %p63_p6, %p57_p3 }
   0xf   :  { %67 = shalt.err (!%p64_p7)
}
  0x10   :  { %17 = dma.hbm_to_vmem [thread:$0]  %s130_s0, 512, %s15_s7, [#allocation3]  }
  0x11   :  { %90 = dma.done.wait [#allocation3], 512  }
  0x12   :  { %91 = vsyncadd [#allocation3], 4294966784  ;;  %s95_s18 = smov [#allocation5]   ;;  %v21_v0 = vld [vmem:[#allocation2] sm:$0xff]  ;;  %v22_v1 = vld [vmem:[#allocation2 + $0x8] sm:$0xff] }
  0x13   :  { %s35_s19 = sshll.u32 %s95_s18, 4  ;;  %v23_v2 = vld [vmem:[#allocation2 + $0x10] sm:$0xff]  ;;  %25 = vst [vmem:[#allocation5] sm:$0xff] %v21_v0  ;;  %26 = vst [vmem:[#allocation5 + $0x8] sm:$0xff] %v22_v1  ;;  %v24_v3 = vld [vmem:[#allocation2 + $0x18] sm:$0xff]  ;;  %s36_s19 = int_to_ptr.vmem [resolvable:$true] %s35_s19 }
  0x14   :  { %27 = vst [vmem:[#allocation5 + $0x10] sm:$0xff] %v23_v2  ;;  %28 = vst [vmem:[#allocation5 + $0x18] sm:$0xff] %v24_v3  ;;  %s68_s20 = scalar_lea.vmem %s36_s19, 512  ;;  %p73_p9 = scmp.lt.s32.totalorder %s36_s19, %s36_s19 }
  0x15   :  { %p69_p8 = scmp.ne.s32.totalorder %s36_s19, %s68_s20  ;;  %p74_p10 = scmp.lt.s32.totalorder %s68_s20, %s68_s20 }
  0x17   :  { %p75_p11 = por %p74_p10, %p73_p9 }
  0x19   :  { %p76_p12 = pnand %p75_p11, %p69_p8 }
  0x1b   :  { %79 = shalt.err (!%p76_p12)
}
  0x1c   :  { %s80_s22 = scalar_lea.hbm %s131_s1, 512 }
  0x1d   :  { %p81_p13 = scmp.ne.s32.totalorder %s131_s1, %s80_s22  ;;  %p84_p0 = scmp.lt.u32.totalorder %s80_s22, %s131_s1 }
  0x1f   :  { %p86_p1 = pnand %p84_p0, %p81_p13 }
  0x21   :  { %89 = shalt.err (!%p86_p1)
}
  0x22   :  { %38 = dma.vmem_to_hbm [thread:$0]  %s36_s19, 512, %s131_s1, [#allocation4]  }
  0x23   :  { %92 = dma.done.wait [#allocation4], 512  }
  0x24   :  { %93 = vsyncadd [#allocation4], 4294966784 }
  0x25   :  { %42 = vsyncpa [#allocation3], 1 }
  0x26   :  { %43 = vsyncpa [#allocation4], 1 }

</bundles_post_ra>
